<compile_context>
chip_gen: v7x
topology: tpu7x:2x2x1
jax: 0.10.0
libtpu: 0.0.40
codegen_flags: <defaults>
</compile_context>

<pallas_src>
import functools

import jax
import jax.numpy as jnp
import numpy as np
from jax.experimental import pallas as pl
from jax.experimental.pallas import tpu as pltpu


def _round_up(x, m):
    return ((x + m - 1) // m) * m


# ---------------------------------------------------------------------------
# Fused kernel:  prob[tq, :] = sigmoid(logits[tq, :]) @ posmap_T
#   - sigmoid in f32 (safe on v5e, whose VPU/EUP have no bf16 path)
#   - MXU operands cast VMEM-locally to `mxu_dtype`, f32 accumulation
# ---------------------------------------------------------------------------
def _prob_kernel(logits_ref, posmap_ref, prob_ref, *, mxu_dtype):
    p = jax.nn.sigmoid(logits_ref[...].astype(jnp.float32))          # [TQ, T]
    acc = jnp.dot(p.astype(mxu_dtype), posmap_ref[...],
                  preferred_element_type=jnp.float32)                 # [TQ, Cpad]
    prob_ref[...] = acc.astype(prob_ref.dtype)


def _pick_tq(q):
    # Largest query tile <= 256, multiple of 8.  Q is padded up to a multiple
    # of it so ragged Q (e.g. 900) still yields >= 2 pipelined grid steps.
    return min(256, _round_up(q, 8))


def postprocess_seginw(out_logits, out_bbox, positive_map, target_sizes,
                       num_select, not_to_xyxy=False,
                       mxu_dtype=jnp.bfloat16, prob_dtype=jnp.float32):
    """JAX/Pallas equivalent of PostProcessSeginw.forward."""
    B, Q, T = out_logits.shape
    C = positive_map.shape[0]
    Cpad = _round_up(C, 128)          # lane-dense (unmasked) prob stores
    TQ = _pick_tq(Q)
    Qpad = _round_up(Q, TQ)
    nQ = Qpad // TQ

    logits = out_logits.astype(jnp.float32)
    if Qpad != Q:
        # Pad values are irrelevant: padded rows are sliced off before top_k.
        logits = jnp.pad(logits, ((0, 0), (0, Qpad - Q), (0, 0)))

    # Grid-invariant operand: transposed / cast / zero-padded once in the
    # wrapper; stays resident in VMEM across the whole grid.
    # TODO(synk): on v7x (64 MiB VMEM), pipeline_mode=pl.Buffered(1) on this
    # BlockSpec would reclaim the second (useless) buffer when T*Cpad is large.
    posmap_T = jnp.zeros((T, Cpad), dtype=mxu_dtype)
    posmap_T = posmap_T.at[:, :C].set(positive_map.astype(mxu_dtype).T)

    prob_bytes = np.dtype(prob_dtype).itemsize
    mxu_bytes = np.dtype(mxu_dtype).itemsize
    cost = pl.CostEstimate(
        flops=2 * B * Qpad * T * Cpad,
        transcendentals=B * Qpad * T,
        bytes_accessed=(B * Qpad * T * 4              # logits read (f32)
                        + T * Cpad * mxu_bytes        # posmap read
                        + B * Qpad * Cpad * prob_bytes))  # prob write

    kernel = functools.partial(_prob_kernel, mxu_dtype=mxu_dtype)
    prob = pl.pallas_call(
        kernel,
        out_shape=jax.ShapeDtypeStruct((B, Qpad, Cpad), prob_dtype),
        grid=(B, nQ),
        in_specs=[
            pl.BlockSpec((None, TQ, T), lambda b, q: (b, q, 0)),    # logits tile
            pl.BlockSpec((T, Cpad), lambda b, q: (0, 0)),           # resident posmap
        ],
        out_specs=pl.BlockSpec((None, TQ, Cpad), lambda b, q: (b, q, 0)),
        compiler_params=pltpu.CompilerParams(
            dimension_semantics=("parallel", "parallel"),
            vmem_limit_bytes=32 * 1024 * 1024),
        cost_estimate=cost,
    )(logits, posmap_T)

    # ---- glue: top-k + gather + box convert + scale, in plain JAX ----------
    # TODO(synk): torch.topk / torch.gather have no clean Pallas TPU equivalent.
    # Slice away Q-padding AND class-padding BEFORE top_k: the scan shrinks by
    # Cpad/C (16x at C=8) and labels are guaranteed < C (no sentinel needed).
    flat = prob[:, :Q, :C].astype(jnp.float32).reshape(B, Q * C)
    k = min(num_select, Q * C)        # cheap guard (torch.topk would error here)
    topk_values, topk_indexes = jax.lax.top_k(flat, k)
    scores = topk_values
    topk_boxes = topk_indexes // C
    labels = topk_indexes % C

    # Gather the selected raw boxes, then convert / scale.  cxcywh->xyxy is
    # elementwise, so gather-then-convert equals the reference's
    # convert-then-gather while touching only B*k*4 elements.
    boxes = jnp.take_along_axis(out_bbox.astype(jnp.float32),
                                topk_boxes[:, :, None], axis=1)       # [B, k, 4]
    if not not_to_xyxy:
        cx, cy, w, h = jnp.split(boxes, 4, axis=-1)
        boxes = jnp.concatenate(
            [cx - 0.5 * w, cy - 0.5 * h, cx + 0.5 * w, cy + 0.5 * h], axis=-1)
    img_h = target_sizes[:, 0].astype(jnp.float32)
    img_w = target_sizes[:, 1].astype(jnp.float32)
    scale_fct = jnp.stack([img_w, img_h, img_w, img_h], axis=1)        # [B, 4]
    boxes = boxes * scale_fct[:, None, :]

    results = [{'scores': scores[i], 'labels': labels[i], 'boxes': boxes[i]}
               for i in range(B)]
    return scores, labels, boxes, results


# ---------------------------------------------------------------------------
# Pure-JAX reference (mirrors the kernel's MXU operand dtype for a tight check)
# ---------------------------------------------------------------------------
def _reference(out_logits, out_bbox, positive_map, target_sizes, num_select,
               mxu_dtype=jnp.bfloat16):
    p = jax.nn.sigmoid(out_logits.astype(jnp.float32)).astype(mxu_dtype)
    prob = jnp.dot(p, positive_map.astype(mxu_dtype).T,
                   preferred_element_type=jnp.float32)                 # [B, Q, C]
    B, Q, C = prob.shape
    vals, idx = jax.lax.top_k(prob.reshape(B, Q * C), num_select)
    topk_boxes = idx // C
    labels = idx % C
    boxes = jnp.take_along_axis(out_bbox.astype(jnp.float32),
                                topk_boxes[:, :, None], axis=1)
    cx, cy, w, h = jnp.split(boxes, 4, axis=-1)
    boxes = jnp.concatenate(
        [cx - 0.5 * w, cy - 0.5 * h, cx + 0.5 * w, cy + 0.5 * h], axis=-1)
    img_h, img_w = target_sizes[:, 0], target_sizes[:, 1]
    scale_fct = jnp.stack([img_w, img_h, img_w, img_h], axis=1)
    return vals, labels, boxes * scale_fct[:, None, :]


if __name__ == "__main__":
    B, Q, T, C = 2, 512, 64, 8      # batch, queries, text tokens, classes
    num_select = 32                  # module default is 300; small here

    key = jax.random.PRNGKey(0)
    k1, k2 = jax.random.split(key, 2)
    out_logits = jax.random.normal(k1, (B, Q, T), dtype=jnp.float32)
    out_bbox = jax.nn.sigmoid(jax.random.normal(k2, (B, Q, 4), dtype=jnp.float32))

    # Deterministic synthetic positive_map: class c covers a contiguous token
    # span, row-normalized (matches create_positive_map_from_span semantics).
    span = T // C
    rows = jnp.arange(C)[:, None]
    cols = jnp.arange(T)[None, :]
    positive_map = jnp.where(
        (cols >= rows * span) & (cols < (rows + 1) * span),
        1.0 / span, 0.0).astype(jnp.float32)

    target_sizes = jnp.array([[480.0, 640.0], [320.0, 512.0]], dtype=jnp.float32)

    scores, labels, boxes, results = postprocess_seginw(
        out_logits, out_bbox, positive_map, target_sizes, num_select)
    jax.block_until_ready((scores, labels, boxes))

    # ---- correctness vs pure-JAX reference ---------------------------------
    r_scores, r_labels, r_boxes = _reference(
        out_logits, out_bbox, positive_map, target_sizes, num_select)
    scores_np, labels_np, boxes_np = map(np.asarray, (scores, labels, boxes))
    r_scores_np, r_labels_np, r_boxes_np = map(
        np.asarray, (r_scores, r_labels, r_boxes))

    np.testing.assert_allclose(scores_np, r_scores_np, rtol=1e-4, atol=1e-5)
    # Label / box order may only differ where top-k scores are (near-)tied.
    match = labels_np == r_labels_np
    assert match.mean() >= 0.98, (
        f"too many label mismatches: {1.0 - match.mean():.4f}")
    np.testing.assert_allclose(boxes_np[match], r_boxes_np[match],
                               rtol=1e-4, atol=1e-4)

    print("KERNEL_OK")
</pallas_src>

<mosaic_0001>
module attributes {stable_mosaic.version = 11 : i64} {
  func.func @_prob_kernel(%arg0: i32, %arg1: i32, %arg2: memref<1x256x64xf32, #tpu.memory_space<vmem>>, %arg3: memref<64x128xbf16, #tpu.memory_space<vmem>>, %arg4: memref<1x256x128xf32, #tpu.memory_space<vmem>>) attributes {dimension_semantics = [#tpu.dimension_semantics<parallel>, #tpu.dimension_semantics<parallel>], iteration_bounds = array<i64: 2, 2>, scalar_prefetch = 0 : i64, scratch_operands = 0 : i64, tpu.core_type = #tpu.core_type<tc>, window_params = [{transform_indices = @transform_0, window_bounds = array<i64: 1, 256, 64>}, {pipeline_mode = #tpu.pipeline_mode<synchronous>, transform_indices = @transform_1, window_bounds = array<i64: 64, 128>}, {transform_indices = @transform_2, window_bounds = array<i64: 1, 256, 128>}]} {
    %c0 = arith.constant 0 : index
    %c0_0 = arith.constant 0 : index
    %c0_1 = arith.constant 0 : index
    %0 = vector.load %arg2[%c0, %c0_0, %c0_1] : memref<1x256x64xf32, #tpu.memory_space<vmem>>, vector<1x256x64xf32>
    %1 = vector.shape_cast %0 : vector<1x256x64xf32> to vector<256x64xf32>
    %2 = arith.negf %1 : vector<256x64xf32>
    %3 = math.exp %2 : vector<256x64xf32>
    %cst = arith.constant 1.000000e+00 : f32
    %4 = vector.broadcast %cst : f32 to vector<256x64xf32>
    %5 = arith.addf %4, %3 : vector<256x64xf32>
    %6 = arith.divf %4, %5 : vector<256x64xf32>
    %7 = arith.truncf %6 : vector<256x64xf32> to vector<256x64xbf16>
    %c0_2 = arith.constant 0 : index
    %c0_3 = arith.constant 0 : index
    %8 = vector.load %arg3[%c0_2, %c0_3] : memref<64x128xbf16, #tpu.memory_space<vmem>>, vector<64x128xbf16>
    %cst_4 = arith.constant dense<0.000000e+00> : vector<256x128xf32>
    %9 = tpu.matmul %7, %8, %cst_4 {dimension_numbers = #tpu.dot_dimension_numbers<[1], [0], [0], [1], [0, 0, 1, 1], [], []>} : vector<256x64xbf16>, vector<64x128xbf16>, vector<256x128xf32> -> vector<256x128xf32>
    %c0_5 = arith.constant 0 : index
    %c0_6 = arith.constant 0 : index
    %c0_7 = arith.constant 0 : index
    %10 = vector.load %arg4[%c0_5, %c0_6, %c0_7] : memref<1x256x128xf32, #tpu.memory_space<vmem>>, vector<1x256x128xf32>
    %11 = vector.shape_cast %10 : vector<1x256x128xf32> to vector<256x128xf32>
    %12 = vector.shape_cast %9 : vector<256x128xf32> to vector<1x256x128xf32>
    tpu.vector_store %arg4[%c0_5, %c0_6, %c0_7], %12 {strides = array<i32>} : memref<1x256x128xf32, #tpu.memory_space<vmem>>, vector<1x256x128xf32>,
    return
  }
  func.func @transform_0(%arg0: i32, %arg1: i32) -> (i32, i32, i32) {
    %c0_i32 = arith.constant 0 : i32
    %c0_i32_0 = arith.constant 0 : i32
    return %arg0, %arg1, %c0_i32 : i32, i32, i32
  }
  func.func @transform_1(%arg0: i32, %arg1: i32) -> (i32, i32) {
    %c0_i32 = arith.constant 0 : i32
    %c0_i32_0 = arith.constant 0 : i32
    %c0_i32_1 = arith.constant 0 : i32
    return %c0_i32, %c0_i32_0 : i32, i32
  }
  func.func @transform_2(%arg0: i32, %arg1: i32) -> (i32, i32, i32) {
    %c0_i32 = arith.constant 0 : i32
    %c0_i32_0 = arith.constant 0 : i32
    return %arg0, %arg1, %c0_i32 : i32, i32, i32
  }
}

</mosaic_0001>

<bundles_post_ra>
// kernel: tpu_custom_call.1
= control target key start
LH: loop header
LB: loop body
LE: loop exit
PB: predicated region body
PF: predicated region fallthrough
CT: control target
= control target key end

     0   :  { %7 = vsyncpa [#allocation3], 0  ;;  %s1484_s0 = inlined_call_operand.vmem [shape: f32[2,512,64], index: 0, kind: input, shape index: {}]   ;;  %s1485_s1 = inlined_call_operand.vmem [shape: bf16[64,128], index: 1, kind: input, shape index: {}]   ;;  %s1486_s2 = inlined_call_operand.hbm [shape: f32[2,512,128], index: 2, kind: output, shape index: {}]  }
   0x1   :  { %9 = vsyncpa [#allocation3 + $0x1], 0  ;;  %s1240_s9 = smov 0   ;;  %s1242_s10 = smov 0  }
   0x2   :  { %s1244_s11 = smov 0   ;;  %s1246_s12 = smov 0  }
   0x3   :  { %s1248_s13 = smov 0   ;;  %s1250_s14 = smov 0  }
   0x4   :  { %s1252_s15 = smov 0   ;;  %s1254_s16 = smov 0  }
   0x5 LB: > { %s786_s17 = sadd.s32 4294967295, %s1220_s16   ;;  %s787_s18 = sadd.s32 4294967294, %s1220_s16   ;;  %s1220_s16 = sphi %s1254_s16, %s15_s16   ;;  %s1216_s15 = sphi %s1252_s15, %s1495_s15   ;;  %s1212_s14 = sphi %s1250_s14, %s1494_s14   ;;  %s1208_s13 = sphi %s1248_s13, %s1493_s13   ;;  %s1204_s12 = sphi %s1246_s12, %s1492_s12   ;;  %s1200_s11 = sphi %s1244_s11, %s1491_s11   ;;  %s1196_s10 = sphi %s1242_s10, %s1490_s10   ;;  %s1192_s9 = sphi %s1240_s9, %s1489_s9  }
   0x6   : > { %s24_s19 = sadd.s32 1, %s1212_s14  ;;  %s27_s20 = sadd.s32 1, %s1216_s15 }
   0x7   : > { %p25_p0 = scmp.ge.s32.totalorder %s24_s19, 2  ;;  %p95_p1 = scmp.ne.s32.totalorder %s1200_s11, %s1196_s10 }
   0x8   : > { %p96_p2 = scmp.eq.s32.totalorder %s786_s17, 3  ;;  %p101_p5 = scmp.ne.s32.totalorder %s1196_s10, %s1192_s9 }
   0x9   : > { %s1497_s19 = smov (%p25_p0, %s24_s19), 0  ;;  %s1499_s20 = smov (!%p25_p0, %s27_s20), %s1216_s15 }
   0xa   : > { %s81_s21 = ssub.s32 %s1212_s14, %s1497_s19  ;;  %p1291_p3 = por %p96_p2, %p95_p1 }
   0xb   : > { %p29_p4 = scmp.ge.s32.totalorder %s1499_s20, 2  ;;  %p102_p6 = scmp.eq.s32.totalorder %s787_s18, 3 }
   0xc   : > { %p790_p7 = scmp.ge.s32.totalorder %s1220_s16, 1  ;;  %p136_p9 = scmp.lt.s32.totalorder %s1220_s16, 5 }
   0xd   : > { %s1501_s20 = smov (%p29_p4, %s1499_s20), 0  ;;  %p1300_p8 = por %p102_p6, %p101_p5 }
   0xe   : > { %s80_s24 = ssub.s32 %s1216_s15, %s1501_s20  ;;  %s85_s25 = sadd.s32 1, %s1200_s11 }
   0xf   : > { %s82_s26 = sor.u32 %s81_s21, %s80_s24  ;;  %p137_p10 = pnand %p790_p7, %p136_p9 }
  0x10   : > { %p83_p11 = scmp.eq.s32.totalorder %s82_s26, 0  ;;  %v994_v0 = vld [vmem:[%s1485_s1] sm:$0xff] (!%p137_p10)   ;;  %s1315_s30 = sshll.u32 (!%p137_p10), %s1204_s12, 5  ;;  %v995_v1 = vld [vmem:[%s1485_s1 + $0x8] sm:$0xff] (!%p137_p10)   ;;  %v996_v2 = vld [vmem:[%s1485_s1 + $0x10] sm:$0xff] (!%p137_p10)   ;;  %vm446_vm0 = vcmask (!%p137_p10), 523264  }
  0x11   : > { %140 = sbr.rel (%p137_p10) target bundleno = 346 (0x15a), region = 28  ;;  %p163_p12 = scmp.lt.s32.totalorder (!%p137_p10), %s1208_s13, 1  ;;  %873 = vmatprep.subr.bf16.mxu0 (!%p137_p10), %v994_v0  ;;  %913 = vmatprep.subr.bf16.mxu1 (!%p137_p10), %v994_v0  ;;  %v997_v3 = vld [vmem:[%s1485_s1 + $0x18] sm:$0xff] (!%p137_p10)  }
  0x12   : > { %s1309_s27 = scalar_select %p83_p11, %s1200_s11, %s85_s25  }
  0x13   : > { %p165_p13 = scmp.lt.s32.totalorder (!%p137_p10), %s1315_s30, 63  ;;  %874 = vmatpush3.bf16.msra.mxu0 (!%p137_p10), %v994_v0  ;;  %917 = vmatpush3.bf16.msra.mxu1 (!%p137_p10), %v994_v0  ;;  %s159_s29 = sand.u32 (!%p137_p10), 1, %s1196_s10  }
  0x14   : > { %875 = vmatprep.subr.bf16.mxu0 (!%p137_p10), %v995_v1  ;;  %914 = vmatprep.subr.bf16.mxu1 (!%p137_p10), %v995_v1  ;;  %s791_s3 = sshll.u32 (!%p137_p10), %s159_s29, 8  ;;  %s1222_s21 = smov (!%p137_p10), [#allocation2]  }
  0x15   : > { %s1386_s4 = scalar_lea.vmem (!%p137_p10), [#allocation2], %s791_s3  ;;  %s1130_s24 = sshll.u32 (!%p137_p10), %s1222_s21, 4  ;;  %s1131_s24 = int_to_ptr.vmem [resolvable:$false] %s1130_s24 }
  0x16   : > { %s1132_s25 = scalar_lea.vmem (!%p137_p10), %s1131_s24, 8192 }
  0x17   : > { %876 = vmatpush3.bf16.msra.mxu0 (!%p137_p10), %v995_v1  ;;  %918 = vmatpush3.bf16.msra.mxu1 (!%p137_p10), %v995_v1 }
  0x18   : > { %s164_s5 = scalar_select %p163_p12, %s1208_s13, 1  ;;  %877 = vmatprep.subr.bf16.mxu0 %v996_v2  ;;  %915 = vmatprep.subr.bf16.mxu1 %v996_v2 }
  0x19   : > { %s166_s8 = scalar_select %p165_p13, %s1315_s30, 63 }
  0x1a   : > { %s793_s12 = sshll.u32 %s164_s5, 6  ;;  %s849_s5 = sshll.u32 %s1208_s13, 6 }
  0x1b   : > { %s168_s17 = sadd.s32 %s793_s12, %s166_s8  ;;  %878 = vmatpush3.bf16.msra.mxu0 %v996_v2  ;;  %919 = vmatpush3.bf16.msra.mxu1 %v996_v2  ;;  %s701_s6 = sadd.s32 %s849_s5, %s1315_s30 }
  0x1c   : > { %s794_s18 = sshll.u32 %s168_s17, 3  ;;  %879 = vmatprep.subr.bf16.mxu0 %v997_v3  ;;  %916 = vmatprep.subr.bf16.mxu1 %v997_v3  ;;  %s850_s7 = sshll.u32 %s701_s6, 7 }
  0x1d   : > { %s1333_s28 = scalar_lea.vmem %s1484_s0, %s794_s18  ;;  %s704_s8 = sshll.u32 %s1386_s4, 4  ;;  %s1424_s8 = int_to_ptr.vmem [resolvable:$true] %s704_s8 }
  0x1e   : > { %v174_v4 = vld [vmem:[%s1333_s28] sm:$0xff]  ;;  %v175_v5 = vld [vmem:[%s1333_s28 + $0x8] sm:$0xff]  ;;  %v176_v10 = vld [vmem:[%s1333_s28 + $0x10] sm:$0xff]  ;;  %s1419_s18 = scalar_lea.hbm %s1486_s2, %s850_s7  ;;  %s1432_s13 = scalar_lea.sflag [#allocation3], %s159_s29 }
  0x1f   : > { %v190_v6 = vld [vmem:[%s1333_s28 + $0x80] sm:$0xff]  ;;  %v795_v7 = vmul.f32 -1.442695, %v174_v4  ;;  %v796_v8 = vmul.f32 -1.442695, %v175_v5  ;;  %v191_v9 = vld [vmem:[%s1333_s28 + $0x88] sm:$0xff]  ;;  %880 = vmatpush3.bf16.msra.mxu0 %v997_v3  ;;  %920 = vmatpush3.bf16.msra.mxu1 %v997_v3  ;;  %p1133_p4 = scmp.lt.s32.totalorder %s1424_s8, %s1131_s24 }
  0x20   : > { %v811_v11 = vmul.f32 -1.442695, %v190_v6  ;;  %v812_v12 = vmul.f32 -1.442695, %v191_v9  ;;  %v177_v13 = vld [vmem:[%s1333_s28 + $0x18] sm:$0xff]  ;;  %v192_v14 = vld [vmem:[%s1333_s28 + $0x90] sm:$0xff] }
  0x21   : > { %998 = vpow2.f32 %v795_v7  ;;  %v797_v15 = vmul.f32 -1.442695, %v176_v10  ;;  %v193_v16 = vld [vmem:[%s1333_s28 + $0x98] sm:$0xff]  ;;  %v798_v17 = vmul.f32 -1.442695, %v177_v13  ;;  %v178_v18 = vld [vmem:[%s1333_s28 + $0x20] sm:$0xff] }
  0x22   : > { %1000 = vpow2.f32 %v796_v8  ;;  %v813_v19 = vmul.f32 -1.442695, %v192_v14  ;;  %v179_v20 = vld [vmem:[%s1333_s28 + $0x28] sm:$0xff]  ;;  %v814_v21 = vmul.f32 -1.442695, %v193_v16  ;;  %v194_v22 = vld [vmem:[%s1333_s28 + $0xa0] sm:$0xff] }
  0x23   : > { %1002 = vpow2.f32 %v811_v11  ;;  %v799_v23 = vmul.f32 -1.442695, %v178_v18  ;;  %v195_v24 = vld [vmem:[%s1333_s28 + $0xa8] sm:$0xff]  ;;  %v800_v25 = vmul.f32 -1.442695, %v179_v20  ;;  %v180_v26 = vld [vmem:[%s1333_s28 + $0x30] sm:$0xff] }
  0x24   : > { %1004 = vpow2.f32 %v812_v12  ;;  %v815_v27 = vmul.f32 -1.442695, %v194_v22  ;;  %v816_v28 = vmul.f32 -1.442695, %v195_v24  ;;  %v801_v29 = vmul.f32 -1.442695, %v180_v26 }
  0x25   : > { %1006 = vpow2.f32 %v797_v15  ;;  %v181_v47 = vld [vmem:[%s1333_s28 + $0x38] sm:$0xff]  ;;  %v196_v52 = vld [vmem:[%s1333_s28 + $0xb0] sm:$0xff]  ;;  %v182_v59 = vld [vmem:[%s1333_s28 + $0x40] sm:$0xff]  ;;  %s1126_s30 = scalar_lea.vmem %s1424_s8, 4096 }
  0x26   : > { %1008 = vpow2.f32 %v798_v17  ;;  %v802_v55 = vmul.f32 -1.442695, %v181_v47  ;;  %v197_v56 = vld [vmem:[%s1333_s28 + $0xb8] sm:$0xff]  ;;  %v817_v62 = vmul.f32 -1.442695, %v196_v52  ;;  %v183_v63 = vld [vmem:[%s1333_s28 + $0x48] sm:$0xff]  ;;  %p1127_p0 = scmp.ne.s32.totalorder %s1424_s8, %s1126_s30  ;;  %p1134_p5 = scmp.lt.s32.totalorder %s1132_s25, %s1126_s30 }
  0x27   : > { %1010 = vpow2.f32 %v813_v19  ;;  %v818_v1 = vmul.f32 -1.442695, %v197_v56  ;;  %v198_v2 = vld [vmem:[%s1333_s28 + $0xc0] sm:$0xff]  ;;  %v803_v5 = vmul.f32 -1.442695, %v182_v59  ;;  %v199_v6 = vld [vmem:[%s1333_s28 + $0xc8] sm:$0xff] }
  0x28   : > { %1012 = vpow2.f32 %v814_v21  ;;  %v804_v8 = vmul.f32 -1.442695, %v183_v63  ;;  %v184_v9 = vld [vmem:[%s1333_s28 + $0x50] sm:$0xff]  ;;  %v819_v12 = vmul.f32 -1.442695, %v198_v2  ;;  %v185_v13 = vld [vmem:[%s1333_s28 + $0x58] sm:$0xff]  ;;  %p1128_p1 = pnand %p1127_p0, %p1291_p3  ;;  %p1135_p6 = por %p1134_p5, %p1133_p4 }
  0x29   : > { %1014 = vpow2.f32 %v799_v23  ;;  %v820_v15 = vmul.f32 -1.442695, %v199_v6  ;;  %v200_v16 = vld [vmem:[%s1333_s28 + $0xd0] sm:$0xff]  ;;  %v805_v19 = vmul.f32 -1.442695, %v184_v9  ;;  %v201_v20 = vld [vmem:[%s1333_s28 + $0xd8] sm:$0xff] }
  0x2a   : > { %1016 = vpow2.f32 %v800_v25  ;;  %v806_v22 = vmul.f32 -1.442695, %v185_v13  ;;  %v186_v23 = vld [vmem:[%s1333_s28 + $0x60] sm:$0xff]  ;;  %v821_v26 = vmul.f32 -1.442695, %v200_v16  ;;  %v203_v59 = vld [vmem:[%s1333_s28 + $0xe8] sm:$0xff]  ;;  %p1129_p2 = pneg %p1128_p1 }
  0x2b   : > { %v999_v30 = vpop.eup %998  ;;  %1018 = vpow2.f32 %v815_v27  ;;  %v188_v63 = vld [vmem:[%s1333_s28 + $0x70] sm:$0xff]  ;;  %v189_v2 = vld [vmem:[%s1333_s28 + $0x78] sm:$0xff] }
  0x2c   : > { %v1001_v31 = vpop.eup %1000  ;;  %v302_v32 = vadd.f32 1.0, %v999_v30  ;;  %1020 = vpow2.f32 %v816_v28  ;;  %v822_v28 = vmul.f32 -1.442695, %v201_v20  ;;  %v204_v6 = vld [vmem:[%s1333_s28 + $0xf0] sm:$0xff]  ;;  %v809_v9 = vmul.f32 -1.442695, %v188_v63  ;;  %p1136_p7 = pnand %p1135_p6, %p1129_p2 }
  0x2d   : > { %v1003_v33 = vpop.eup %1002  ;;  %v303_v34 = vadd.f32 1.0, %v1001_v31  ;;  %1022 = vpow2.f32 %v801_v29  ;;  %v187_v29 = vld [vmem:[%s1333_s28 + $0x68] sm:$0xff] }
  0x2e   : > { %v1005_v35 = vpop.eup %1004  ;;  %1024 = vrcp.f32 %v302_v32  ;;  %v318_v36 = vadd.f32 1.0, %v1003_v33  ;;  %v807_v32 = vmul.f32 -1.442695, %v186_v23 }
  0x2f   : > { %v1007_v37 = vpop.eup %1006  ;;  %1026 = vrcp.f32 %v303_v34  ;;  %v319_v38 = vadd.f32 1.0, %v1005_v35 }
  0x30   : > { %v1009_v39 = vpop.eup %1008  ;;  %1028 = vrcp.f32 %v318_v36  ;;  %v304_v40 = vadd.f32 1.0, %v1007_v37  ;;  %v808_v36 = vmul.f32 -1.442695, %v187_v29 }
  0x31   : > { %v1011_v41 = vpop.eup %1010  ;;  %1030 = vrcp.f32 %v319_v38  ;;  %v305_v42 = vadd.f32 1.0, %v1009_v39 }
  0x32   : > { %v1013_v43 = vpop.eup %1012  ;;  %1032 = vrcp.f32 %v304_v40  ;;  %v320_v44 = vadd.f32 1.0, %v1011_v41 }
  0x33   : > { %v1015_v45 = vpop.eup %1014  ;;  %1034 = vrcp.f32 %v305_v42  ;;  %v321_v46 = vadd.f32 1.0, %v1013_v43 }
  0x34   : > { %v1017_v48 = vpop.eup %1016  ;;  %1036 = vrcp.f32 %v320_v44  ;;  %v306_v49 = vadd.f32 1.0, %v1015_v45 }
  0x35   : > { %v1019_v50 = vpop.eup %1018  ;;  %1038 = vrcp.f32 %v321_v46  ;;  %v307_v51 = vadd.f32 1.0, %v1017_v48 }
  0x36   : > { %v1021_v53 = vpop.eup %1020  ;;  %1040 = vrcp.f32 %v306_v49  ;;  %v322_v54 = vadd.f32 1.0, %v1019_v50 }
  0x37   : > { %v1023_v57 = vpop.eup %1022  ;;  %1042 = vrcp.f32 %v307_v51  ;;  %v323_v58 = vadd.f32 1.0, %v1021_v53 }
  0x38   : > { %v1025_v60 = vpop.eup %1024  ;;  %1044 = vrcp.f32 %v322_v54  ;;  %v308_v61 = vadd.f32 1.0, %v1023_v57  ;;  %v202_v54 = vld [vmem:[%s1333_s28 + $0xe0] sm:$0xff] }
  0x39   : > { %v1027_v0 = vpop.eup %1026  ;;  %1046 = vrcp.f32 %v323_v58 }
  0x3a   : > { %v1029_v3 = vpop.eup %1028  ;;  %v398_v4 = vpack.c.bf16 %v1027_v0, %v1025_v60  ;;  %1048 = vpow2.f32 %v802_v55 }
  0x3b   : > { %v1031_v7 = vpop.eup %1030  ;;  %1050 = vrcp.f32 %v308_v61 }
  0x3c   : > { %v1033_v10 = vpop.eup %1032  ;;  %881 = vmatprep.mubr.msk.bf16.mxu0 %vm446_vm0, %v398_v4  ;;  %v406_v11 = vpack.c.bf16 %v1031_v7, %v1029_v3  ;;  %1052 = vpow2.f32 %v817_v62  ;;  %v823_v62 = vmul.f32 -1.442695, %v202_v54 }
  0x3d   : > { %v1035_v14 = vpop.eup %1034  ;;  %1054 = vpow2.f32 %v818_v1 }
  0x3e   : > { %v1037_v17 = vpop.eup %1036  ;;  %897 = vmatprep.mubr.msk.bf16.mxu1 %vm446_vm0, %v406_v11  ;;  %v399_v18 = vpack.c.bf16 %v1035_v14, %v1033_v10  ;;  %1056 = vpow2.f32 %v803_v5  ;;  %v824_v5 = vmul.f32 -1.442695, %v203_v59  ;;  %v205_v10 = vld [vmem:[%s1333_s28 + $0xf8] sm:$0xff] }
  0x3f   : > { %v1039_v21 = vpop.eup %1038  ;;  %1058 = vpow2.f32 %v804_v8 }
  0x40   : > { %v1041_v24 = vpop.eup %1040  ;;  %882 = vmatmul.mubr.msk.bf16.vlgmr.msra.gmra.mrb[0].mxu0 %vm446_vm0, %v399_v18  ;;  %v407_v25 = vpack.c.bf16 %v1039_v21, %v1037_v17  ;;  %1060 = vpow2.f32 %v819_v12  ;;  %v810_v12 = vmul.f32 -1.442695, %v189_v2  ;;  %v826_v17 = vmul.f32 -1.442695, %v205_v10 }
  0x41   : > { %v1043_v27 = vpop.eup %1042  ;;  %1062 = vpow2.f32 %v820_v15  ;;  %v825_v15 = vmul.f32 -1.442695, %v204_v6 }
  0x42   : > { %v1045_v30 = vpop.eup %1044  ;;  %898 = vmatmul.mubr.msk.bf16.vlgmr.msra.gmra.mrb[0].mxu1 %vm446_vm0, %v407_v25  ;;  %v400_v31 = vpack.c.bf16 %v1043_v27, %v1041_v24  ;;  %1064 = vpow2.f32 %v805_v19 }
  0x43   : > { %v1047_v33 = vpop.eup %1046  ;;  %1066 = vpow2.f32 %v806_v22 }
  0x44   : > { %v1049_v34 = vpop.eup %1048  ;;  %885 = vmatprep.mubr.msk.bf16.mxu0 %vm446_vm0, %v400_v31  ;;  %v408_v35 = vpack.c.bf16 %v1047_v33, %v1045_v30  ;;  %1068 = vpow2.f32 %v821_v26 }
  0x45   : > { %v1051_v37 = vpop.eup %1050  ;;  %v309_v38 = vadd.f32 1.0, %v1049_v34  ;;  %1070 = vpow2.f32 %v822_v28 }
  0x46   : > { %v1053_v39 = vpop.eup %1052  ;;  %901 = vmatprep.mubr.msk.bf16.mxu1 %vm446_vm0, %v408_v35  ;;  %1072 = vpow2.f32 %v807_v32 }
  0x47   : > { %v1055_v40 = vpop.eup %1054  ;;  %1074 = vrcp.f32 %v309_v38  ;;  %v324_v41 = vadd.f32 1.0, %v1053_v39 }
  0x48   : > { %v1057_v42 = vpop.eup %1056  ;;  %v325_v43 = vadd.f32 1.0, %v1055_v40  ;;  %1076 = vpow2.f32 %v808_v36 }
  0x49   : > { %v1059_v44 = vpop.eup %1058  ;;  %1078 = vrcp.f32 %v324_v41  ;;  %v310_v45 = vadd.f32 1.0, %v1057_v42 }
  0x4a   : > { %v1061_v46 = vpop.eup %1060  ;;  %1080 = vrcp.f32 %v325_v43  ;;  %v311_v47 = vadd.f32 1.0, %v1059_v44 }
  0x4b   : > { %v1063_v48 = vpop.eup %1062  ;;  %1082 = vrcp.f32 %v310_v45  ;;  %v326_v49 = vadd.f32 1.0, %v1061_v46 }
  0x4c   : > { %v1065_v50 = vpop.eup %1064  ;;  %1084 = vrcp.f32 %v311_v47  ;;  %v327_v51 = vadd.f32 1.0, %v1063_v48 }
  0x4d   : > { %v1067_v52 = vpop.eup %1066  ;;  %1086 = vrcp.f32 %v326_v49  ;;  %v312_v53 = vadd.f32 1.0, %v1065_v50 }
  0x4e   : > { %v1069_v55 = vpop.eup %1068  ;;  %1088 = vrcp.f32 %v327_v51  ;;  %v313_v56 = vadd.f32 1.0, %v1067_v52 }
  0x4f   : > { %v1071_v57 = vpop.eup %1070  ;;  %1090 = vrcp.f32 %v312_v53  ;;  %v328_v58 = vadd.f32 1.0, %v1069_v55 }
  0x50   : > { %v1073_v60 = vpop.eup %1072  ;;  %1092 = vrcp.f32 %v313_v56  ;;  %v329_v61 = vadd.f32 1.0, %v1071_v57 }
  0x51   : > { %v1075_v0 = vpop.eup %1074  ;;  %1094 = vrcp.f32 %v328_v58  ;;  %v314_v1 = vadd.f32 1.0, %v1073_v60 }
  0x52   : > { %v1077_v3 = vpop.eup %1076  ;;  %v401_v4 = vpack.c.bf16 %v1075_v0, %v1051_v37  ;;  %1096 = vrcp.f32 %v329_v61 }
  0x53   : > { %v1079_v7 = vpop.eup %1078  ;;  %v315_v8 = vadd.f32 1.0, %v1077_v3  ;;  %1098 = vrcp.f32 %v314_v1 }
  0x54   : > { %v1081_v11 = vpop.eup %1080  ;;  %886 = vmatmul.mubr.msk.bf16.gmra.mrb[4].mxu0 %vm446_vm0, %v401_v4  ;;  %1100 = vpow2.f32 %v823_v62 }
  0x55   : > { %v1083_v13 = vpop.eup %1082  ;;  %v409_v14 = vpack.c.bf16 %v1081_v11, %v1079_v7  ;;  %1102 = vrcp.f32 %v315_v8 }
  0x56   : > { %v1085_v16 = vpop.eup %1084  ;;  %1104 = vpow2.f32 %v824_v5 }
  0x57   : > { %v1087_v18 = vpop.eup %1086  ;;  %902 = vmatmul.mubr.msk.bf16.gmra.mrb[4].mxu1 %vm446_vm0, %v409_v14  ;;  %v402_v19 = vpack.c.bf16 %v1085_v16, %v1083_v13  ;;  %1106 = vpow2.f32 %v809_v9 }
  0x58   : > { %v1089_v20 = vpop.eup %1088  ;;  %1108 = vpow2.f32 %v810_v12 }
  0x59   : > { %v1091_v21 = vpop.eup %1090  ;;  %889 = vmatprep.mubr.msk.bf16.mxu0 %vm446_vm0, %v402_v19  ;;  %v410_v22 = vpack.c.bf16 %v1089_v20, %v1087_v18  ;;  %1110 = vpow2.f32 %v825_v15 }
  0x5a   : > { %v1093_v23 = vpop.eup %1092  ;;  %1112 = vpow2.f32 %v826_v17 }
  0x5b   : > { %v1095_v24 = vpop.eup %1094  ;;  %905 = vmatprep.mubr.msk.bf16.mxu1 %vm446_vm0, %v410_v22  ;;  %v403_v25 = vpack.c.bf16 %v1093_v23, %v1091_v21 }
  0x5c   : > { %v1097_v26 = vpop.eup %1096 }
  0x5d   : > { %v1099_v27 = vpop.eup %1098  ;;  %890 = vmatmul.mubr.msk.bf16.gmra.mrb[8].mxu0 %vm446_vm0, %v403_v25  ;;  %v411_v28 = vpack.c.bf16 %v1097_v26, %v1095_v24 }
  0x5e   : > { %v1101_v29 = vpop.eup %1100 }
  0x5f   : > { %v1103_v30 = vpop.eup %1102  ;;  %906 = vmatmul.mubr.msk.bf16.gmra.mrb[8].mxu1 %vm446_vm0, %v411_v28  ;;  %v330_v31 = vadd.f32 1.0, %v1101_v29 }
  0x60   : > { %v1105_v32 = vpop.eup %1104  ;;  %v404_v33 = vpack.c.bf16 %v1103_v30, %v1099_v27 }
  0x61   : > { %v1107_v34 = vpop.eup %1106  ;;  %v331_v35 = vadd.f32 1.0, %v1105_v32  ;;  %1114 = vrcp.f32 %v330_v31 }
  0x62   : > { %v1109_v36 = vpop.eup %1108  ;;  %893 = vmatprep.mubr.msk.bf16.mxu0 %vm446_vm0, %v404_v33  ;;  %v316_v37 = vadd.f32 1.0, %v1107_v34 }
  0x63   : > { %v1111_v38 = vpop.eup %1110  ;;  %1116 = vrcp.f32 %v331_v35  ;;  %v317_v39 = vadd.f32 1.0, %v1109_v36 }
  0x64   : > { %v1113_v40 = vpop.eup %1112  ;;  %1118 = vrcp.f32 %v316_v37  ;;  %v332_v41 = vadd.f32 1.0, %v1111_v38 }
  0x65   : > { %1120 = vrcp.f32 %v317_v39  ;;  %v333_v42 = vadd.f32 1.0, %v1113_v40 }
  0x66   : > { %1122 = vrcp.f32 %v332_v41 }
  0x67   : > { %1124 = vrcp.f32 %v333_v42 }
  0x6b   : > { %v1115_v43 = vpop.eup %1114 }
  0x6d   : > { %v1117_v44 = vpop.eup %1116 }
  0x6e   : > { %v1119_v45 = vpop.eup %1118  ;;  %v412_v46 = vpack.c.bf16 %v1117_v44, %v1115_v43 }
  0x6f   : > { %v1121_v47 = vpop.eup %1120 }
  0x70   : > { %v1123_v48 = vpop.eup %1122  ;;  %909 = vmatprep.mubr.msk.bf16.mxu1 %vm446_vm0, %v412_v46  ;;  %v405_v49 = vpack.c.bf16 %v1121_v47, %v1119_v45 }
  0x71   : > { %v1125_v50 = vpop.eup %1124 }
  0x72   : > { %894 = vmatmul.mubr.msk.bf16.gmra.mrb[12].mxu0 %vm446_vm0, %v405_v49  ;;  %v413_v51 = vpack.c.bf16 %v1125_v50, %v1123_v48 }
  0x74   : > { %910 = vmatmul.mubr.msk.bf16.gmra.mrb[12].mxu1 %vm446_vm0, %v413_v51 }
 0x113   : > { %v883_v52 = vpop.f32.mrb[0].mxu0 }
 0x114   : > { %658 = vst [vmem:[%s1386_s4 + $0x10] sm:$0xff] %v883_v52  ;;  %v529_v53 = vpop.f32.mrb[1].mxu0 }
 0x115   : > { %v899_v54 = vpop.f32.mrb[0].mxu1  ;;  %656 = vst [vmem:[%s1386_s4] sm:$0xff] %v529_v53  ;;  %v884_v55 = vpop.f32.mrb[2].mxu0 }
 0x116   : > { %674 = vst [vmem:[%s1386_s4 + $0x90] sm:$0xff] %v899_v54  ;;  %v593_v56 = vpop.f32.mrb[1].mxu1  ;;  %659 = vst [vmem:[%s1386_s4 + $0x18] sm:$0xff] %v884_v55  ;;  %v532_v57 = vpop.f32.mrb[3].mxu0 }
 0x117   : > { %672 = vst [vmem:[%s1386_s4 + $0x80] sm:$0xff] %v593_v56  ;;  %v900_v58 = vpop.f32.mrb[2].mxu1  ;;  %657 = vst [vmem:[%s1386_s4 + $0x8] sm:$0xff] %v532_v57 }
 0x118   : > { %675 = vst [vmem:[%s1386_s4 + $0x98] sm:$0xff] %v900_v58  ;;  %v596_v59 = vpop.f32.mrb[3].mxu1 }
 0x119   : > { %673 = vst [vmem:[%s1386_s4 + $0x88] sm:$0xff] %v596_v59 }
 0x127   : > { %v887_v60 = vpop.f32.mrb[4].mxu0 }
 0x128   : > { %662 = vst [vmem:[%s1386_s4 + $0x30] sm:$0xff] %v887_v60  ;;  %v545_v61 = vpop.f32.mrb[5].mxu0 }
 0x129   : > { %660 = vst [vmem:[%s1386_s4 + $0x20] sm:$0xff] %v545_v61  ;;  %v888_v62 = vpop.f32.mrb[6].mxu0 }
 0x12a   : > { %v903_v63 = vpop.f32.mrb[4].mxu1  ;;  %663 = vst [vmem:[%s1386_s4 + $0x38] sm:$0xff] %v888_v62  ;;  %v548_v0 = vpop.f32.mrb[7].mxu0 }
 0x12b   : > { %678 = vst [vmem:[%s1386_s4 + $0xb0] sm:$0xff] %v903_v63  ;;  %v609_v1 = vpop.f32.mrb[5].mxu1  ;;  %661 = vst [vmem:[%s1386_s4 + $0x28] sm:$0xff] %v548_v0 }
 0x12c   : > { %676 = vst [vmem:[%s1386_s4 + $0xa0] sm:$0xff] %v609_v1  ;;  %v904_v2 = vpop.f32.mrb[6].mxu1 }
 0x12d   : > { %679 = vst [vmem:[%s1386_s4 + $0xb8] sm:$0xff] %v904_v2  ;;  %v612_v3 = vpop.f32.mrb[7].mxu1 }
 0x12e   : > { %677 = vst [vmem:[%s1386_s4 + $0xa8] sm:$0xff] %v612_v3 }
 0x130   : > { %v891_v4 = vpop.f32.mrb[8].mxu0 }
 0x131   : > { %666 = vst [vmem:[%s1386_s4 + $0x50] sm:$0xff] %v891_v4  ;;  %v561_v5 = vpop.f32.mrb[9].mxu0 }
 0x132   : > { %v907_v6 = vpop.f32.mrb[8].mxu1  ;;  %664 = vst [vmem:[%s1386_s4 + $0x40] sm:$0xff] %v561_v5  ;;  %v892_v7 = vpop.f32.mrb[10].mxu0 }
 0x133   : > { %682 = vst [vmem:[%s1386_s4 + $0xd0] sm:$0xff] %v907_v6  ;;  %v625_v8 = vpop.f32.mrb[9].mxu1  ;;  %667 = vst [vmem:[%s1386_s4 + $0x58] sm:$0xff] %v892_v7  ;;  %v564_v9 = vpop.f32.mrb[11].mxu0 }
 0x134   : > { %680 = vst [vmem:[%s1386_s4 + $0xc0] sm:$0xff] %v625_v8  ;;  %v908_v10 = vpop.f32.mrb[10].mxu1  ;;  %665 = vst [vmem:[%s1386_s4 + $0x48] sm:$0xff] %v564_v9 }
 0x135   : > { %683 = vst [vmem:[%s1386_s4 + $0xd8] sm:$0xff] %v908_v10  ;;  %v628_v11 = vpop.f32.mrb[11].mxu1 }
 0x136   : > { %681 = vst [vmem:[%s1386_s4 + $0xc8] sm:$0xff] %v628_v11 }
 0x145   : > { %v895_v12 = vpop.f32.mrb[12].mxu0 }
 0x146   : > { %670 = vst [vmem:[%s1386_s4 + $0x70] sm:$0xff] %v895_v12  ;;  %v577_v13 = vpop.f32.mrb[13].mxu0 }
 0x147   : > { %v911_v14 = vpop.f32.mrb[12].mxu1  ;;  %668 = vst [vmem:[%s1386_s4 + $0x60] sm:$0xff] %v577_v13  ;;  %v896_v15 = vpop.f32.mrb[14].mxu0 }
 0x148   : > { %686 = vst [vmem:[%s1386_s4 + $0xf0] sm:$0xff] %v911_v14  ;;  %v641_v16 = vpop.f32.mrb[13].mxu1  ;;  %671 = vst [vmem:[%s1386_s4 + $0x78] sm:$0xff] %v896_v15  ;;  %v580_v17 = vpop.f32.mrb[15].mxu0 }
 0x149   : > { %684 = vst [vmem:[%s1386_s4 + $0xe0] sm:$0xff] %v641_v16  ;;  %v912_v18 = vpop.f32.mrb[14].mxu1  ;;  %669 = vst [vmem:[%s1386_s4 + $0x68] sm:$0xff] %v580_v17 }
 0x14a   : > { %687 = vst [vmem:[%s1386_s4 + $0xf8] sm:$0xff] %v912_v18  ;;  %v644_v19 = vpop.f32.mrb[15].mxu1 }
 0x14b   : > { %685 = vst [vmem:[%s1386_s4 + $0xe8] sm:$0xff] %v644_v19 }
 0x14c   : > { %1139 = shalt.err (!%p1136_p7)
}
 0x14d   : > { %s1140_s26 = scalar_lea.hbm %s1419_s18, 4096  ;;  %s1144_s3 = scalar_lea.hbm %s1486_s2, 16384 }
 0x14e   : > { %p1141_p9 = scmp.ne.s32.totalorder %s1419_s18, %s1140_s26  ;;  %p1145_p12 = scmp.lt.u32.totalorder %s1419_s18, %s1486_s2 }
 0x14f   : > { %p1146_p13 = scmp.lt.u32.totalorder %s1144_s3, %s1140_s26  ;;  %p1148_p1 = scmp.lt.u32.totalorder %s1140_s26, %s1419_s18 }
 0x150   : > { %p1142_p10 = pnand %p1141_p9, %p1291_p3 }
 0x151   : > { %p1147_p0 = por %p1146_p13, %p1145_p12 }
 0x152   : > { %p1143_p11 = pneg %p1142_p10 }
 0x153   : > { %p1149_p2 = por %p1148_p1, %p1147_p0 }
 0x155   : > { %p1150_p4 = pnand %p1149_p2, %p1143_p11 }
 0x157   : > { %1153 = shalt.err (!%p1150_p4)
}
 0x158   : > { %s1223_s6 = smov 128   ;;  %s1224_s7 = smov 8  }
 0x159   : > { %921 = dma.vmem_to_hbm [thread:$0]  (%p1291_p3), %s1424_s8, 4096, %s1419_s18, %s1432_s13, %s1223_s6, %s1223_s6, %s1224_s7  }
 0x15a PF: > { %p927_p5 = scmp.ge.s32.totalorder %s1220_s16, 2  ;;  %s719_s12 = sand.u32 1, %s1192_s9  }
 0x15b   : > { %s720_s17 = scalar_lea.sflag [#allocation3], %s719_s12 }
 0x15c   : > { %p924_p6 = pnand %p927_p5, %p1300_p8 }
 0x15e   : > { %1187 = dma.done.wait (!%p924_p6), %s720_s17, 4096  }
 0x15f   : > { %1189 = vsyncadd (!%p924_p6), %s720_s17, 4294963200  ;;  %s15_s16 = sadd.s32 1, %s1220_s16   ;;  %s1489_s9 = smov %s1196_s10 }
 0x160   : > { %p12_p7 = scmp.ge.s32.totalorder %s15_s16, 6   ;;  %s1490_s10 = smov %s1200_s11 }
 0x161   : > { %s1491_s11 = smov %s1309_s27  ;;  %s1492_s12 = smov %s1212_s14 }
 0x162   : > { %s1493_s13 = smov %s1216_s15  ;;  %s1494_s14 = smov %s1497_s19 }
 0x163   : > { %s1495_s15 = smov %s1501_s20  ;;  %14 = sbr.rel (!%p12_p7) target bundleno = 5 (0x5), region = 63 }
 0x16a   :  { %725 = vsyncpa [#allocation3], 1 }
 0x16b   :  { %727 = vsyncpa [#allocation3 + $0x1], 1 }

</bundles_post_ra>
